<compile_context>
chip_gen: v7x
topology: tpu7x:2x2x1
jax: 0.10.0
libtpu: 0.0.40
codegen_flags: <defaults>
</compile_context>

<pallas_src>
import jax
import jax.numpy as jnp
from jax.experimental import pallas as pl
from jax.experimental.pallas import tpu as pltpu


def _round_up(n, m):
    return ((n + m - 1) // m) * m


def mlp_kernel(x_ref, w1_ref, b1_ref, w2_ref, b2_ref, w3_ref, b3_ref, o_ref):
    # x / weights are bf16 (native MXU input); accumulate in f32; bias+ReLU in f32 on VPU.
    x = x_ref[...]

    h1 = jnp.dot(x, w1_ref[...], preferred_element_type=jnp.float32) + b1_ref[...]
    h1 = jnp.maximum(h1, 0.0).astype(jnp.bfloat16)

    h2 = jnp.dot(h1, w2_ref[...], preferred_element_type=jnp.float32) + b2_ref[...]
    h2 = jnp.maximum(h2, 0.0).astype(jnp.bfloat16)

    out = jnp.dot(h2, w3_ref[...], preferred_element_type=jnp.float32) + b3_ref[...]
    o_ref[...] = out.astype(o_ref.dtype)


def rede_neural_forward(x, params, *, tile_b=256):
    """params: dict with w1,b1,w2,b2,w3,b3 where w_i are PyTorch-layout (out, in)."""
    w1, b1 = params["w1"], params["b1"]
    w2, b2 = params["w2"], params["b2"]
    w3, b3 = params["w3"], params["b3"]

    B, IN = x.shape
    HID = int(w1.shape[0])
    OUT = int(w3.shape[0])

    LANE, SUB = 128, 8
    IN_P = _round_up(IN, LANE)
    HID_P = _round_up(HID, LANE)
    OUT_P = _round_up(OUT, LANE)

    # Batch tile: multiple of 8 sublanes; cap at (padded) batch so tiny batches still work.
    tile_b = _round_up(min(tile_b, _round_up(B, SUB)), SUB)
    B_P = _round_up(B, tile_b)

    def pad2(a, rows, cols):
        return jnp.pad(a, ((0, rows - a.shape[0]), (0, cols - a.shape[1])))

    # Pre-transpose to (in, out), zero-pad to lane-dense shapes, cast weights/x to bf16.
    w1_t = pad2(w1.T, IN_P, HID_P).astype(jnp.bfloat16)
    w2_t = pad2(w2.T, HID_P, HID_P).astype(jnp.bfloat16)
    w3_t = pad2(w3.T, HID_P, OUT_P).astype(jnp.bfloat16)
    b1_r = jnp.pad(b1, (0, HID_P - HID)).reshape(1, HID_P).astype(jnp.float32)
    b2_r = jnp.pad(b2, (0, HID_P - HID)).reshape(1, HID_P).astype(jnp.float32)
    b3_r = jnp.pad(b3, (0, OUT_P - OUT)).reshape(1, OUT_P).astype(jnp.float32)
    x_p = jnp.pad(x, ((0, B_P - B), (0, IN_P - IN))).astype(jnp.bfloat16)

    grid = (B_P // tile_b,)

    flops = 2 * B_P * (IN_P * HID_P + HID_P * HID_P + HID_P * OUT_P)
    bytes_accessed = (
        x_p.size * 2
        + (w1_t.size + w2_t.size + w3_t.size) * 2
        + (b1_r.size + b2_r.size + b3_r.size) * 4
        + B_P * OUT_P * 4
    )

    out_padded = pl.pallas_call(
        mlp_kernel,
        out_shape=jax.ShapeDtypeStruct((B_P, OUT_P), jnp.float32),
        grid_spec=pltpu.PrefetchScalarGridSpec(
            num_scalar_prefetch=0,
            grid=grid,
            in_specs=[
                pl.BlockSpec((tile_b, IN_P), lambda i: (i, 0)),   # x: tiled over batch
                pl.BlockSpec((IN_P, HID_P), lambda i: (0, 0)),    # weights/bias: resident
                pl.BlockSpec((1, HID_P), lambda i: (0, 0)),
                pl.BlockSpec((HID_P, HID_P), lambda i: (0, 0)),
                pl.BlockSpec((1, HID_P), lambda i: (0, 0)),
                pl.BlockSpec((HID_P, OUT_P), lambda i: (0, 0)),
                pl.BlockSpec((1, OUT_P), lambda i: (0, 0)),
            ],
            out_specs=pl.BlockSpec((tile_b, OUT_P), lambda i: (i, 0)),
        ),
        compiler_params=pltpu.CompilerParams(
            dimension_semantics=("parallel",),       # batch axis shards across TCs (v7x)
            vmem_limit_bytes=64 * 1024 * 1024,       # fits v7x's 64 MiB per-TC VMEM
        ),
        cost_estimate=pl.CostEstimate(
            flops=flops, transcendentals=0, bytes_accessed=bytes_accessed),
    )(x_p, w1_t, b1_r, w2_t, b2_r, w3_t, b3_r)

    return out_padded[:B, :OUT]


def init_params(key, tamanho_entrada, tamanho_oculto, num_classes):
    """Deterministic init mimicking nn.Linear (uniform(-1/sqrt(fan_in), 1/sqrt(fan_in)))."""
    ks = jax.random.split(key, 6)

    def linear_init(kw, kb, fan_in, fan_out):
        bound = 1.0 / jnp.sqrt(jnp.float32(fan_in))
        w = jax.random.uniform(kw, (fan_out, fan_in), jnp.float32, -bound, bound)
        b = jax.random.uniform(kb, (fan_out,), jnp.float32, -bound, bound)
        return w, b

    w1, b1 = linear_init(ks[0], ks[1], tamanho_entrada, tamanho_oculto)
    w2, b2 = linear_init(ks[2], ks[3], tamanho_oculto, tamanho_oculto)
    w3, b3 = linear_init(ks[4], ks[5], tamanho_oculto, num_classes)
    return {"w1": w1, "b1": b1, "w2": w2, "b2": b2, "w3": w3, "b3": b3}


def reference_forward(x, p):
    h1 = jnp.maximum(x @ p["w1"].T + p["b1"], 0.0)
    h2 = jnp.maximum(h1 @ p["w2"].T + p["b2"], 0.0)
    return h2 @ p["w3"].T + p["b3"]


if __name__ == "__main__":
    key = jax.random.PRNGKey(0)
    k_x, k_p = jax.random.split(key)

    batch = 8
    tamanho_entrada = 16
    tamanho_oculto = 32
    num_classes = 8

    x = jax.random.normal(k_x, (batch, tamanho_entrada), jnp.float32)
    params = init_params(k_p, tamanho_entrada, tamanho_oculto, num_classes)

    out = rede_neural_forward(x, params)
    out = jax.block_until_ready(out)

    ref = reference_forward(x, params)
    assert out.shape == (batch, num_classes)
    # bf16 MXU inputs with f32 accumulation: loosen tolerance vs the f32 reference.
    assert jnp.allclose(out, ref, atol=5e-2, rtol=5e-2)

    print("KERNEL_OK")
</pallas_src>

<mosaic_0001>
module attributes {stable_mosaic.version = 11 : i64} {
  func.func @mlp_kernel(%arg0: i32, %arg1: memref<8x128xbf16, #tpu.memory_space<vmem>>, %arg2: memref<128x128xbf16, #tpu.memory_space<vmem>>, %arg3: memref<1x128xf32, #tpu.memory_space<vmem>>, %arg4: memref<128x128xbf16, #tpu.memory_space<vmem>>, %arg5: memref<1x128xf32, #tpu.memory_space<vmem>>, %arg6: memref<128x128xbf16, #tpu.memory_space<vmem>>, %arg7: memref<1x128xf32, #tpu.memory_space<vmem>>, %arg8: memref<8x128xf32, #tpu.memory_space<vmem>>) attributes {dimension_semantics = [#tpu.dimension_semantics<parallel>], iteration_bounds = array<i64: 1>, scalar_prefetch = 0 : i64, scratch_operands = 0 : i64, tpu.core_type = #tpu.core_type<tc>, window_params = [{transform_indices = @transform_0, window_bounds = array<i64: 8, 128>}, {pipeline_mode = #tpu.pipeline_mode<synchronous>, transform_indices = @transform_1, window_bounds = array<i64: 128, 128>}, {pipeline_mode = #tpu.pipeline_mode<synchronous>, transform_indices = @transform_2, window_bounds = array<i64: 1, 128>}, {pipeline_mode = #tpu.pipeline_mode<synchronous>, transform_indices = @transform_3, window_bounds = array<i64: 128, 128>}, {pipeline_mode = #tpu.pipeline_mode<synchronous>, transform_indices = @transform_4, window_bounds = array<i64: 1, 128>}, {pipeline_mode = #tpu.pipeline_mode<synchronous>, transform_indices = @transform_5, window_bounds = array<i64: 128, 128>}, {pipeline_mode = #tpu.pipeline_mode<synchronous>, transform_indices = @transform_6, window_bounds = array<i64: 1, 128>}, {transform_indices = @transform_7, window_bounds = array<i64: 8, 128>}]} {
    %c0 = arith.constant 0 : index
    %c0_0 = arith.constant 0 : index
    %0 = vector.load %arg1[%c0, %c0_0] : memref<8x128xbf16, #tpu.memory_space<vmem>>, vector<8x128xbf16>
    %c0_1 = arith.constant 0 : index
    %c0_2 = arith.constant 0 : index
    %1 = vector.load %arg2[%c0_1, %c0_2] : memref<128x128xbf16, #tpu.memory_space<vmem>>, vector<128x128xbf16>
    %cst = arith.constant dense<0.000000e+00> : vector<8x128xf32>
    %2 = tpu.matmul %0, %1, %cst {dimension_numbers = #tpu.dot_dimension_numbers<[1], [0], [0], [1], [0, 0, 1, 1], [], []>} : vector<8x128xbf16>, vector<128x128xbf16>, vector<8x128xf32> -> vector<8x128xf32>
    %c0_3 = arith.constant 0 : index
    %c0_4 = arith.constant 0 : index
    %3 = vector.load %arg3[%c0_3, %c0_4] : memref<1x128xf32, #tpu.memory_space<vmem>>, vector<1x128xf32>
    %4 = vector.broadcast %3 : vector<1x128xf32> to vector<8x128xf32>
    %5 = arith.addf %2, %4 : vector<8x128xf32>
    %cst_5 = arith.constant 0.000000e+00 : f32
    %6 = vector.broadcast %cst_5 : f32 to vector<8x128xf32>
    %7 = arith.maximumf %5, %6 : vector<8x128xf32>
    %8 = arith.truncf %7 : vector<8x128xf32> to vector<8x128xbf16>
    %c0_6 = arith.constant 0 : index
    %c0_7 = arith.constant 0 : index
    %9 = vector.load %arg4[%c0_6, %c0_7] : memref<128x128xbf16, #tpu.memory_space<vmem>>, vector<128x128xbf16>
    %cst_8 = arith.constant dense<0.000000e+00> : vector<8x128xf32>
    %10 = tpu.matmul %8, %9, %cst_8 {dimension_numbers = #tpu.dot_dimension_numbers<[1], [0], [0], [1], [0, 0, 1, 1], [], []>} : vector<8x128xbf16>, vector<128x128xbf16>, vector<8x128xf32> -> vector<8x128xf32>
    %c0_9 = arith.constant 0 : index
    %c0_10 = arith.constant 0 : index
    %11 = vector.load %arg5[%c0_9, %c0_10] : memref<1x128xf32, #tpu.memory_space<vmem>>, vector<1x128xf32>
    %12 = vector.broadcast %11 : vector<1x128xf32> to vector<8x128xf32>
    %13 = arith.addf %10, %12 : vector<8x128xf32>
    %cst_11 = arith.constant 0.000000e+00 : f32
    %14 = vector.broadcast %cst_11 : f32 to vector<8x128xf32>
    %15 = arith.maximumf %13, %14 : vector<8x128xf32>
    %16 = arith.truncf %15 : vector<8x128xf32> to vector<8x128xbf16>
    %c0_12 = arith.constant 0 : index
    %c0_13 = arith.constant 0 : index
    %17 = vector.load %arg6[%c0_12, %c0_13] : memref<128x128xbf16, #tpu.memory_space<vmem>>, vector<128x128xbf16>
    %cst_14 = arith.constant dense<0.000000e+00> : vector<8x128xf32>
    %18 = tpu.matmul %16, %17, %cst_14 {dimension_numbers = #tpu.dot_dimension_numbers<[1], [0], [0], [1], [0, 0, 1, 1], [], []>} : vector<8x128xbf16>, vector<128x128xbf16>, vector<8x128xf32> -> vector<8x128xf32>
    %c0_15 = arith.constant 0 : index
    %c0_16 = arith.constant 0 : index
    %19 = vector.load %arg7[%c0_15, %c0_16] : memref<1x128xf32, #tpu.memory_space<vmem>>, vector<1x128xf32>
    %20 = vector.broadcast %19 : vector<1x128xf32> to vector<8x128xf32>
    %21 = arith.addf %18, %20 : vector<8x128xf32>
    %c0_17 = arith.constant 0 : index
    %c0_18 = arith.constant 0 : index
    %22 = vector.load %arg8[%c0_17, %c0_18] : memref<8x128xf32, #tpu.memory_space<vmem>>, vector<8x128xf32>
    tpu.vector_store %arg8[%c0_17, %c0_18], %21 {strides = array<i32>} : memref<8x128xf32, #tpu.memory_space<vmem>>, vector<8x128xf32>,
    return
  }
  func.func @transform_0(%arg0: i32) -> (i32, i32) {
    %c0_i32 = arith.constant 0 : i32
    %c0_i32_0 = arith.constant 0 : i32
    return %arg0, %c0_i32 : i32, i32
  }
  func.func @transform_1(%arg0: i32) -> (i32, i32) {
    %c0_i32 = arith.constant 0 : i32
    %c0_i32_0 = arith.constant 0 : i32
    %c0_i32_1 = arith.constant 0 : i32
    return %c0_i32, %c0_i32_0 : i32, i32
  }
  func.func @transform_2(%arg0: i32) -> (i32, i32) {
    %c0_i32 = arith.constant 0 : i32
    %c0_i32_0 = arith.constant 0 : i32
    %c0_i32_1 = arith.constant 0 : i32
    return %c0_i32, %c0_i32_0 : i32, i32
  }
  func.func @transform_3(%arg0: i32) -> (i32, i32) {
    %c0_i32 = arith.constant 0 : i32
    %c0_i32_0 = arith.constant 0 : i32
    %c0_i32_1 = arith.constant 0 : i32
    return %c0_i32, %c0_i32_0 : i32, i32
  }
  func.func @transform_4(%arg0: i32) -> (i32, i32) {
    %c0_i32 = arith.constant 0 : i32
    %c0_i32_0 = arith.constant 0 : i32
    %c0_i32_1 = arith.constant 0 : i32
    return %c0_i32, %c0_i32_0 : i32, i32
  }
  func.func @transform_5(%arg0: i32) -> (i32, i32) {
    %c0_i32 = arith.constant 0 : i32
    %c0_i32_0 = arith.constant 0 : i32
    %c0_i32_1 = arith.constant 0 : i32
    return %c0_i32, %c0_i32_0 : i32, i32
  }
  func.func @transform_6(%arg0: i32) -> (i32, i32) {
    %c0_i32 = arith.constant 0 : i32
    %c0_i32_0 = arith.constant 0 : i32
    %c0_i32_1 = arith.constant 0 : i32
    return %c0_i32, %c0_i32_0 : i32, i32
  }
  func.func @transform_7(%arg0: i32) -> (i32, i32) {
    %c0_i32 = arith.constant 0 : i32
    %c0_i32_0 = arith.constant 0 : i32
    return %arg0, %c0_i32 : i32, i32
  }
}

</mosaic_0001>

<bundles_post_ra>
// kernel: tpu_custom_call.1
= control target key start
LH: loop header
LB: loop body
LE: loop exit
PB: predicated region body
PF: predicated region fallthrough
CT: control target
= control target key end

     0   :  { %12 = vsyncpa [#allocation3], 0  ;;  %s995_s0 = inlined_call_operand.hbm [shape: bf16[8,128], index: 0, kind: input, shape index: {}]   ;;  %s996_s1 = inlined_call_operand.hbm [shape: bf16[128,128], index: 1, kind: input, shape index: {}]   ;;  %s997_s2 = inlined_call_operand.hbm [shape: f32[1,128], index: 2, kind: input, shape index: {}]   ;;  %s998_s3 = inlined_call_operand.hbm [shape: bf16[128,128], index: 3, kind: input, shape index: {}]   ;;  %s999_s4 = inlined_call_operand.hbm [shape: f32[1,128], index: 4, kind: input, shape index: {}]   ;;  %s1000_s5 = inlined_call_operand.hbm [shape: bf16[128,128], index: 5, kind: input, shape index: {}]   ;;  %s1001_s6 = inlined_call_operand.hbm [shape: f32[1,128], index: 6, kind: input, shape index: {}]   ;;  %s1002_s7 = inlined_call_operand.hbm [shape: f32[8,128], index: 7, kind: output, shape index: {}]  }
   0x1   :  { %13 = vsyncpa [#allocation6], 0 }
   0x2   :  { %14 = vsyncpa [#allocation9], 0 }
   0x3   :  { %15 = vsyncpa [#allocation12], 0 }
   0x4   :  { %16 = vsyncpa [#allocation4], 0  ;;  %s808_s24 = smov [#allocation5]   ;;  %s622_s28 = scalar_lea.hbm %s996_s1, 1024 }
   0x5   :  { %s32_s25 = sshll.u32 %s808_s24, 4  ;;  %p623_p0 = scmp.ne.s32.totalorder %s996_s1, %s622_s28  ;;  %s33_s25 = int_to_ptr.vmem [resolvable:$true] %s32_s25 }
   0x6   :  { %p626_p1 = scmp.lt.u32.totalorder %s622_s28, %s996_s1 }
   0x8   :  { %p628_p2 = pnand %p626_p1, %p623_p0 }
   0xa   :  { %631 = shalt.err (!%p628_p2)
}
   0xb   :  { %s632_s10 = scalar_lea.vmem %s33_s25, 1024  ;;  %p637_p4 = scmp.lt.s32.totalorder %s33_s25, %s33_s25 }
   0xc   :  { %p633_p3 = scmp.ne.s32.totalorder %s33_s25, %s632_s10  ;;  %p638_p5 = scmp.lt.s32.totalorder %s632_s10, %s632_s10 }
   0xe   :  { %p639_p6 = por %p638_p5, %p637_p4 }
  0x10   :  { %p640_p7 = pnand %p639_p6, %p633_p3 }
  0x12   :  { %643 = shalt.err (!%p640_p7)
}
  0x13   :  { %s809_s11 = smov 64   ;;  %s810_s12 = smov 4  }
  0x14   :  { %38 = dma.hbm_to_vmem [thread:$0]  %s996_s1, 1024, %s33_s25, [#allocation6], %s809_s11, %s809_s11, %s810_s12  }
  0x15   :  { %s811_s15 = smov [#allocation8]   ;;  %s812_s17 = smov [#allocation11]  }
  0x16   :  { %s54_s16 = sshll.u32 %s811_s15, 4  ;;  %s76_s18 = sshll.u32 %s812_s17, 4  ;;  %s55_s16 = int_to_ptr.vmem [resolvable:$true] %s54_s16  ;;  %s77_s18 = int_to_ptr.vmem [resolvable:$true] %s76_s18 }
  0x17   :  { %s644_s21 = scalar_lea.hbm %s998_s3, 1024 }
  0x18   :  { %p645_p8 = scmp.ne.s32.totalorder %s998_s3, %s644_s21  ;;  %p648_p9 = scmp.lt.u32.totalorder %s644_s21, %s998_s3 }
  0x1a   :  { %p650_p10 = pnand %p648_p9, %p645_p8 }
  0x1c   :  { %653 = shalt.err (!%p650_p10)
}
  0x1d   :  { %s654_s1 = scalar_lea.vmem %s55_s16, 1024  ;;  %p659_p12 = scmp.lt.s32.totalorder %s55_s16, %s55_s16 }
  0x1e   :  { %p655_p11 = scmp.ne.s32.totalorder %s55_s16, %s654_s1  ;;  %p660_p13 = scmp.lt.s32.totalorder %s654_s1, %s654_s1 }
  0x20   :  { %p661_p0 = por %p660_p13, %p659_p12 }
  0x22   :  { %p662_p1 = pnand %p661_p0, %p655_p11 }
  0x24   :  { %665 = shalt.err (!%p662_p1)
}
  0x25   :  { %60 = dma.hbm_to_vmem [thread:$0]  %s998_s3, 1024, %s55_s16, [#allocation9], %s809_s11, %s809_s11, %s810_s12  }
  0x26   :  { %s666_s30 = scalar_lea.hbm %s1000_s5, 1024 }
  0x27   :  { %p667_p2 = scmp.ne.s32.totalorder %s1000_s5, %s666_s30  ;;  %p670_p3 = scmp.lt.u32.totalorder %s666_s30, %s1000_s5 }
  0x29   :  { %p672_p4 = pnand %p670_p3, %p667_p2 }
  0x2b   :  { %675 = shalt.err (!%p672_p4)
}
  0x2c   :  { %s676_s14 = scalar_lea.vmem %s77_s18, 1024  ;;  %p681_p6 = scmp.lt.s32.totalorder %s77_s18, %s77_s18 }
  0x2d   :  { %p677_p5 = scmp.ne.s32.totalorder %s77_s18, %s676_s14  ;;  %p682_p7 = scmp.lt.s32.totalorder %s676_s14, %s676_s14 }
  0x2f   :  { %p683_p8 = por %p682_p7, %p681_p6 }
  0x31   :  { %p684_p9 = pnand %p683_p8, %p677_p5 }
  0x33   :  { %687 = shalt.err (!%p684_p9)
}
  0x34   :  { %82 = dma.hbm_to_vmem [thread:$0]  %s1000_s5, 1024, %s77_s18, [#allocation12], %s809_s11, %s809_s11, %s810_s12  }
  0x35   :  { %s813_s16 = smov [#allocation2]   ;;  %s814_s19 = smov [#allocation7]  }
  0x36   :  { %s23_s17 = sshll.u32 %s813_s16, 4  ;;  %s45_s20 = sshll.u32 %s814_s19, 4  ;;  %s24_s17 = int_to_ptr.vmem [resolvable:$true] %s23_s17  ;;  %s46_s20 = int_to_ptr.vmem [resolvable:$true] %s45_s20 }
  0x37   :  { %s688_s23 = scalar_lea.hbm %s995_s0, 64 }
  0x38   :  { %p689_p10 = scmp.ne.s32.totalorder %s995_s0, %s688_s23  ;;  %p692_p11 = scmp.lt.u32.totalorder %s688_s23, %s995_s0 }
  0x3a   :  { %p694_p12 = pnand %p692_p11, %p689_p10 }
  0x3c   :  { %697 = shalt.err (!%p694_p12)
}
  0x3d   :  { %s698_s5 = scalar_lea.vmem %s24_s17, 64  ;;  %p703_p0 = scmp.lt.s32.totalorder %s24_s17, %s24_s17 }
  0x3e   :  { %p699_p13 = scmp.ne.s32.totalorder %s24_s17, %s698_s5  ;;  %p704_p1 = scmp.lt.s32.totalorder %s698_s5, %s698_s5 }
  0x40   :  { %p705_p2 = por %p704_p1, %p703_p0 }
  0x42   :  { %p706_p3 = pnand %p705_p2, %p699_p13 }
  0x44   :  { %709 = shalt.err (!%p706_p3)
}
  0x45   :  { %26 = dma.hbm_to_vmem [thread:$0]  %s995_s0, 64, %s24_s17, [#allocation3]  }
  0x46   :  { %s710_s28 = scalar_lea.hbm %s997_s2, 16 }
  0x47   :  { %p711_p4 = scmp.ne.s32.totalorder %s997_s2, %s710_s28  ;;  %p714_p5 = scmp.lt.u32.totalorder %s710_s28, %s997_s2 }
  0x49   :  { %p716_p6 = pnand %p714_p5, %p711_p4 }
  0x4b   :  { %719 = shalt.err (!%p716_p6)
}
  0x4c   :  { %s720_s10 = scalar_lea.vmem %s46_s20, 16  ;;  %s724_s13 = scalar_lea.vmem %s46_s20, 32 }
  0x4d   :  { %p721_p7 = scmp.ne.s32.totalorder %s46_s20, %s720_s10  ;;  %p725_p8 = scmp.lt.s32.totalorder %s46_s20, %s46_s20 }
  0x4e   :  { %p726_p9 = scmp.lt.s32.totalorder %s724_s13, %s720_s10 }
  0x50   :  { %p727_p10 = por %p726_p9, %p725_p8 }
  0x52   :  { %p728_p11 = pnand %p727_p10, %p721_p7 }
  0x54   :  { %731 = shalt.err (!%p728_p11)
}
  0x55   :  { %48 = dma.hbm_to_vmem [thread:$0]  %s997_s2, 16, %s46_s20, [#allocation6]  }
  0x56   :  { %s815_s3 = smov [#allocation10]   ;;  %s816_s16 = smov [#allocation13]  }
  0x57   :  { %s67_s15 = sshll.u32 %s815_s3, 4  ;;  %s89_s17 = sshll.u32 %s816_s16, 4  ;;  %s68_s15 = int_to_ptr.vmem [resolvable:$true] %s67_s15  ;;  %s90_s17 = int_to_ptr.vmem [resolvable:$true] %s89_s17 }
  0x58   :  { %s732_s22 = scalar_lea.hbm %s999_s4, 16 }
  0x59   :  { %p733_p12 = scmp.ne.s32.totalorder %s999_s4, %s732_s22  ;;  %p736_p13 = scmp.lt.u32.totalorder %s732_s22, %s999_s4 }
  0x5b   :  { %p738_p0 = pnand %p736_p13, %p733_p12 }
  0x5d   :  { %741 = shalt.err (!%p738_p0)
}
  0x5e   :  { %s742_s2 = scalar_lea.vmem %s68_s15, 16  ;;  %s746_s20 = scalar_lea.vmem %s68_s15, 32 }
  0x5f   :  { %p743_p1 = scmp.ne.s32.totalorder %s68_s15, %s742_s2  ;;  %p747_p2 = scmp.lt.s32.totalorder %s68_s15, %s68_s15 }
  0x60   :  { %p748_p3 = scmp.lt.s32.totalorder %s746_s20, %s742_s2 }
  0x62   :  { %p749_p4 = por %p748_p3, %p747_p2 }
  0x64   :  { %p750_p5 = pnand %p749_p4, %p743_p1 }
  0x66   :  { %753 = shalt.err (!%p750_p5)
}
  0x67   :  { %70 = dma.hbm_to_vmem [thread:$0]  %s999_s4, 16, %s68_s15, [#allocation9]  }
  0x68   :  { %s754_s18 = scalar_lea.hbm %s1001_s6, 16 }
  0x69   :  { %p755_p6 = scmp.ne.s32.totalorder %s1001_s6, %s754_s18  ;;  %p758_p7 = scmp.lt.u32.totalorder %s754_s18, %s1001_s6 }
  0x6b   :  { %p760_p8 = pnand %p758_p7, %p755_p6 }
  0x6d   :  { %763 = shalt.err (!%p760_p8)
}
  0x6e   :  { %s764_s8 = scalar_lea.vmem %s90_s17, 16  ;;  %s768_s9 = scalar_lea.vmem %s90_s17, 32 }
  0x6f   :  { %p765_p9 = scmp.ne.s32.totalorder %s90_s17, %s764_s8  ;;  %p769_p10 = scmp.lt.s32.totalorder %s90_s17, %s90_s17 }
  0x70   :  { %p770_p11 = scmp.lt.s32.totalorder %s768_s9, %s764_s8 }
  0x72   :  { %p771_p12 = por %p770_p11, %p769_p10 }
  0x74   :  { %p772_p13 = pnand %p771_p12, %p765_p9 }
  0x76   :  { %775 = shalt.err (!%p772_p13)
}
  0x77   :  { %92 = dma.hbm_to_vmem [thread:$0]  %s1001_s6, 16, %s90_s17, [#allocation12]  }
  0x78   :  { %798 = dma.done.wait [#allocation3], 64  }
  0x79   :  { %799 = vsyncadd [#allocation3], 4294967232 }
  0x7a   :  { %800 = dma.done.wait [#allocation6], 1040  }
  0x7b   :  { %801 = vsyncadd [#allocation6], 4294966256 }
  0x7c   :  { %802 = dma.done.wait [#allocation9], 1040  }
  0x7d   :  { %803 = vsyncadd [#allocation9], 4294966256 }
  0x7e   :  { %804 = dma.done.wait [#allocation12], 1040  }
  0x7f   :  { %805 = vsyncadd [#allocation12], 4294966256  ;;  %v817_v0 = vmov 0.0   ;;  %vm818_vm0 = vmmov 0   ;;  %v598_v1 = vld [vmem:[#allocation5] sm:$0xff]   ;;  %v599_v2 = vld [vmem:[#allocation5 + $0x8] sm:$0xff]  }
  0x80   :  { %526 = vmatprep.subr.bf16.mxu0 %v817_v0  ;;  %542 = vmatprep.mubr.msk.bf16.mxu0 %vm818_vm0, %v817_v0  ;;  %v600_v3 = vld [vmem:[#allocation5 + $0x10] sm:$0xff]   ;;  %v606_v4 = vld [vmem:[#allocation8] sm:$0xff]   ;;  %v601_v5 = vld [vmem:[#allocation5 + $0x18] sm:$0xff]   ;;  %s819_s6 = smov [#allocation14]  }
  0x81   :  { %546 = vmatprep.subr.bf16.mxu1 %v817_v0  ;;  %562 = vmatprep.mubr.msk.bf16.mxu1 %vm818_vm0, %v817_v0  ;;  %v607_v6 = vld [vmem:[#allocation8 + $0x8] sm:$0xff]   ;;  %v602_v7 = vld [vmem:[#allocation5 + $0x20] sm:$0xff]   ;;  %v608_v8 = vld [vmem:[#allocation8 + $0x10] sm:$0xff]   ;;  %s460_s13 = sshll.u32 %s819_s6, 4  ;;  %s461_s13 = int_to_ptr.vmem [resolvable:$true] %s460_s13 }
  0x82   :  { %527 = vmatpush3.bf16.msra.mxu0 %v598_v1  ;;  %547 = vmatpush3.bf16.msra.mxu1 %v606_v4  ;;  %v603_v9 = vld [vmem:[#allocation5 + $0x28] sm:$0xff]   ;;  %v609_v10 = vld [vmem:[#allocation8 + $0x18] sm:$0xff]   ;;  %v604_v11 = vld [vmem:[#allocation5 + $0x30] sm:$0xff]   ;;  %s776_s0 = scalar_lea.vmem %s461_s13, 128  ;;  %p781_p1 = scmp.lt.s32.totalorder %s461_s13, %s461_s13 }
  0x83   :  { %528 = vmatprep.subr.bf16.mxu0 %v817_v0  ;;  %548 = vmatprep.subr.bf16.mxu1 %v817_v0  ;;  %v610_v12 = vld [vmem:[#allocation8 + $0x20] sm:$0xff]   ;;  %v605_v13 = vld [vmem:[#allocation5 + $0x38] sm:$0xff]   ;;  %v611_v14 = vld [vmem:[#allocation8 + $0x28] sm:$0xff]   ;;  %p777_p0 = scmp.ne.s32.totalorder %s461_s13, %s776_s0  ;;  %p782_p2 = scmp.lt.s32.totalorder %s776_s0, %s776_s0 }
  0x84   :  { %v115_v15 = vld [vmem:[#allocation2] sm:$0xf]  ;;  %v612_v16 = vld [vmem:[#allocation8 + $0x30] sm:$0xff]   ;;  %v614_v18 = vld [vmem:[#allocation11] sm:$0xff]  }
  0x85   :  { %v613_v17 = vld [vmem:[#allocation8 + $0x38] sm:$0xff]   ;;  %v615_v19 = vld [vmem:[#allocation11 + $0x8] sm:$0xff]   ;;  %v618_v22 = vld [vmem:[#allocation11 + $0x20] sm:$0xff]   ;;  %p783_p3 = por %p782_p2, %p781_p1 }
  0x86   :  { %529 = vmatpush3.bf16.msra.mxu0 %v599_v2  ;;  %549 = vmatpush3.bf16.msra.mxu1 %v607_v6  ;;  %v616_v20 = vld [vmem:[#allocation11 + $0x10] sm:$0xff]   ;;  %v617_v21 = vld [vmem:[#allocation11 + $0x18] sm:$0xff]   ;;  %v619_v23 = vld [vmem:[#allocation11 + $0x28] sm:$0xff]  }
  0x87   :  { %530 = vmatprep.subr.bf16.mxu0 %v817_v0  ;;  %550 = vmatprep.subr.bf16.mxu1 %v817_v0  ;;  %v472_v24 = vld [vmem:[#allocation7] ss:$0 sm:$0xff]  ;;  %v620_v32 = vld [vmem:[#allocation11 + $0x30] sm:$0xff]   ;;  %v481_v34 = vld [vmem:[#allocation10] ss:$0 sm:$0xff]  ;;  %p784_p4 = pnand %p783_p3, %p777_p0 }
  0x88   :  { %v621_v33 = vld [vmem:[#allocation11 + $0x38] sm:$0xff]   ;;  %v490_v42 = vld [vmem:[#allocation13] ss:$0 sm:$0xff] }
  0x8a   :  { %531 = vmatpush3.bf16.msra.mxu0 %v600_v3  ;;  %551 = vmatpush3.bf16.msra.mxu1 %v608_v8 }
  0x8b   :  { %532 = vmatprep.subr.bf16.mxu0 %v817_v0  ;;  %552 = vmatprep.subr.bf16.mxu1 %v817_v0 }
  0x8e   :  { %533 = vmatpush3.bf16.msra.mxu0 %v601_v5  ;;  %553 = vmatpush3.bf16.msra.mxu1 %v609_v10 }
  0x8f   :  { %534 = vmatprep.subr.bf16.mxu0 %v817_v0  ;;  %554 = vmatprep.subr.bf16.mxu1 %v817_v0 }
  0x92   :  { %535 = vmatpush3.bf16.msra.mxu0 %v602_v7  ;;  %555 = vmatpush3.bf16.msra.mxu1 %v610_v12 }
  0x93   :  { %536 = vmatprep.subr.bf16.mxu0 %v817_v0  ;;  %556 = vmatprep.subr.bf16.mxu1 %v817_v0 }
  0x96   :  { %537 = vmatpush3.bf16.msra.mxu0 %v603_v9  ;;  %557 = vmatpush3.bf16.msra.mxu1 %v611_v14 }
  0x97   :  { %538 = vmatprep.subr.bf16.mxu0 %v817_v0  ;;  %558 = vmatprep.subr.bf16.mxu1 %v817_v0 }
  0x9a   :  { %539 = vmatpush3.bf16.msra.mxu0 %v604_v11  ;;  %559 = vmatpush3.bf16.msra.mxu1 %v612_v16 }
  0x9b   :  { %540 = vmatprep.subr.bf16.mxu0 %v817_v0  ;;  %560 = vmatprep.subr.bf16.mxu1 %v817_v0 }
  0x9e   :  { %541 = vmatpush3.bf16.msra.mxu0 %v605_v13  ;;  %561 = vmatpush3.bf16.msra.mxu1 %v613_v17 }
  0x9f   :  { %566 = vmatprep.subr.bf16.mxu0 %v817_v0 }
  0xa1   :  { %543 = vmatmul.mubr.bf16.vlgmr.msra.gmra.mrb[0].mxu0 %v115_v15 }
  0xa2   :  { %582 = vmatprep.mubr.msk.bf16.mxu0 %vm818_vm0, %v817_v0  ;;  %567 = vmatpush3.bf16.msra.mxu0 %v614_v18 }
  0xa3   :  { %568 = vmatprep.subr.bf16.mxu0 %v817_v0 }
  0xa6   :  { %569 = vmatpush3.bf16.msra.mxu0 %v615_v19 }
  0xa7   :  { %570 = vmatprep.subr.bf16.mxu0 %v817_v0 }
  0xaa   :  { %571 = vmatpush3.bf16.msra.mxu0 %v616_v20 }
  0xab   :  { %572 = vmatprep.subr.bf16.mxu0 %v817_v0 }
  0xae   :  { %573 = vmatpush3.bf16.msra.mxu0 %v617_v21 }
  0xaf   :  { %574 = vmatprep.subr.bf16.mxu0 %v817_v0 }
  0xb2   :  { %575 = vmatpush3.bf16.msra.mxu0 %v618_v22 }
  0xb3   :  { %576 = vmatprep.subr.bf16.mxu0 %v817_v0 }
  0xb6   :  { %577 = vmatpush3.bf16.msra.mxu0 %v619_v23 }
  0xb7   :  { %578 = vmatprep.subr.bf16.mxu0 %v817_v0 }
  0xba   :  { %579 = vmatpush3.bf16.msra.mxu0 %v620_v32 }
  0xbb   :  { %580 = vmatprep.subr.bf16.mxu0 %v817_v0 }
  0xbe   :  { %581 = vmatpush3.bf16.msra.mxu0 %v621_v33 }
 0x174   :  { %v221_v25 = vpop.f32.mrb[0].mxu0 }
 0x175   :  { %v222_v26 = vadd.f32 %v472_v24, %v221_v25  ;;  %v544_v27 = vpop.f32.mrb[1].mxu0 }
 0x176   :  { %v224_v28 = vpop.f32.mrb[2].mxu0 }
 0x177   :  { %v227_v29 = vmax.f32 %v222_v26, 0.0  ;;  %v545_v30 = vpop.f32.mrb[3].mxu0 }
 0x179   :  { %v228_v31 = vpack.c.bf16 %v227_v29, %v227_v29 }
 0x17b   :  { %563 = vmatmul.mubr.bf16.vlgmr.msra.gmra.mrb[0].mxu1 %v228_v31 }
 0x24e   :  { %v334_v35 = vpop.f32.mrb[0].mxu1 }
 0x24f   :  { %v335_v36 = vadd.f32 %v481_v34, %v334_v35  ;;  %v564_v37 = vpop.f32.mrb[1].mxu1 }
 0x250   :  { %v337_v38 = vpop.f32.mrb[2].mxu1 }
 0x251   :  { %v340_v39 = vmax.f32 %v335_v36, 0.0  ;;  %v565_v40 = vpop.f32.mrb[3].mxu1 }
 0x253   :  { %v341_v41 = vpack.c.bf16 %v340_v39, %v340_v39 }
 0x255   :  { %583 = vmatmul.mubr.bf16.vlgmr.msra.gmra.mrb[4].mxu0 %v341_v41 }
 0x328   :  { %v447_v43 = vpop.f32.mrb[4].mxu0 }
 0x329   :  { %v448_v44 = vadd.f32 %v490_v42, %v447_v43  ;;  %v584_v45 = vpop.f32.mrb[5].mxu0 }
 0x32a   :  { %v450_v46 = vpop.f32.mrb[6].mxu0 }
 0x32b   :  { %453 = vst [vmem:[#allocation14] sm:$0xff] %v448_v44  ;;  %v585_v47 = vpop.f32.mrb[7].mxu0 }
 0x32c   :  { %787 = shalt.err (!%p784_p4)
}
 0x32d   :  { %s788_s15 = scalar_lea.hbm %s1002_s7, 128 }
 0x32e   :  { %p789_p5 = scmp.ne.s32.totalorder %s1002_s7, %s788_s15  ;;  %p792_p6 = scmp.lt.u32.totalorder %s788_s15, %s1002_s7 }
 0x330   :  { %p794_p7 = pnand %p792_p6, %p789_p5 }
 0x332   :  { %797 = shalt.err (!%p794_p7)
}
 0x333   :  { %463 = dma.vmem_to_hbm [thread:$0]  %s461_s13, 128, %s1002_s7, [#allocation4]  }
 0x334   :  { %806 = dma.done.wait [#allocation4], 128  }
 0x335   :  { %807 = vsyncadd [#allocation4], 4294967168 }
 0x336   :  { %467 = vsyncpa [#allocation3], 1 }
 0x337   :  { %468 = vsyncpa [#allocation6], 1 }
 0x338   :  { %469 = vsyncpa [#allocation9], 1 }
 0x339   :  { %470 = vsyncpa [#allocation12], 1 }
 0x33a   :  { %471 = vsyncpa [#allocation4], 1 }

</bundles_post_ra>
